<compile_context>
chip_gen: v7x
topology: tpu7x:2x2x1
jax: 0.10.0
libtpu: 0.0.40
codegen_flags: <defaults>
</compile_context>

<pallas_src>
import jax
import jax.numpy as jnp
from jax import lax
from jax.experimental import pallas as pl
from jax.experimental.pallas import tpu as pltpu


LANE = 128


def _round_up(x, m):
    return ((x + m - 1) // m) * m


# ----------------------------- Pallas kernels --------------------------------
def _conv_matmul_kernel(p_ref, w_ref, b_ref, o_ref, acc_ref):
    # p_ref: (tm, tk) bf16 | w_ref: (tk, Cp) bf16 | b_ref: (1, Cp) f32
    # o_ref: (tm, Cp) f32  | acc_ref: (tm, Cp) f32 scratch
    k = pl.program_id(1)

    @pl.when(k == 0)
    def _():
        acc_ref[...] = jnp.zeros_like(acc_ref)

    acc_ref[...] += jnp.dot(p_ref[...], w_ref[...],
                            preferred_element_type=jnp.float32)

    @pl.when(k == pl.num_programs(1) - 1)
    def _():
        o_ref[...] = (acc_ref[...] + b_ref[...]).astype(o_ref.dtype)


def _conv_matmul_kernel_nobias(p_ref, w_ref, o_ref, acc_ref):
    k = pl.program_id(1)

    @pl.when(k == 0)
    def _():
        acc_ref[...] = jnp.zeros_like(acc_ref)

    acc_ref[...] += jnp.dot(p_ref[...], w_ref[...],
                            preferred_element_type=jnp.float32)

    @pl.when(k == pl.num_programs(1) - 1)
    def _():
        o_ref[...] = acc_ref[...].astype(o_ref.dtype)


# ----------------------------- Tile selection ---------------------------------
def _vmem_need_bytes(tm, tk, cout_pad, in_bytes=2):
    # double-buffered bf16 P and W tiles, double-buffered f32 out tile,
    # f32 accumulator scratch, f32 bias row (double-buffered, tiny).
    return (2 * tm * tk * in_bytes
            + 2 * tk * cout_pad * in_bytes
            + 2 * tm * cout_pad * 4
            + tm * cout_pad * 4
            + 2 * cout_pad * 4)


def _choose_tk(kdim_pad, cap=512):
    # largest multiple of 128 that divides kdim_pad and is <= cap
    best = LANE
    t = LANE
    while t <= min(kdim_pad, cap):
        if kdim_pad % t == 0:
            best = t
        t += LANE
    return best


def _choose_tiles(M, kdim_pad, cout_pad, *, tm_target=512,
                  vmem_budget=36 * 1024 * 1024):
    tk = _choose_tk(kdim_pad)
    cands = [c for c in (1024, 768, 512, 384, 256, 128, 64, 32, 16)
             if c <= tm_target]
    if not cands:
        cands = [16]

    def fits(c):
        return _vmem_need_bytes(c, tk, cout_pad) <= vmem_budget

    # 1) divides M (no padding copy of patches) and >= 2 grid steps (v7x megacore)
    for c in cands:
        if c <= M and M % c == 0 and M // c >= 2 and fits(c):
            return c, tk
    # 2) divides M
    for c in cands:
        if c <= M and M % c == 0 and fits(c):
            return c, tk
    # 3) fall back to padding M (only for awkward shapes)
    for c in cands:
        if fits(c):
            return c, tk
    return 16, tk


# ----------------------------- Pallas wrapper ---------------------------------
def _pallas_im2col_matmul(patches, weight_mat, bias_row):
    """patches: [M, Kdim_pad] bf16; weight_mat: [Kdim_pad, Cp] bf16;
    bias_row: [1, Cp] f32 or None.  Returns [M, Cp] f32."""
    M, kdim_pad = patches.shape
    cout_pad = weight_mat.shape[1]

    tm, tk = _choose_tiles(M, kdim_pad, cout_pad)

    m_pad = _round_up(M, tm)
    if m_pad != M:
        # Only hit when no clean divisor of M exists.
        patches = jnp.pad(patches, ((0, m_pad - M), (0, 0)))

    grid = (m_pad // tm, kdim_pad // tk)

    in_specs = [
        pl.BlockSpec((tm, tk), lambda i, k: (i, k)),
        pl.BlockSpec((tk, cout_pad), lambda i, k: (k, 0)),
    ]
    operands = [patches, weight_mat]
    if bias_row is not None:
        in_specs.append(pl.BlockSpec((1, cout_pad), lambda i, k: (0, 0)))
        operands.append(bias_row)
        kernel = _conv_matmul_kernel
    else:
        kernel = _conv_matmul_kernel_nobias

    vmem_need = _vmem_need_bytes(tm, tk, cout_pad)
    # Explicit scoped-VMEM budget (re-derived per tile choice; safe on v7x's
    # 64 MiB physical VMEM as well as v5e/v6e).
    vmem_limit = min(max(2 * vmem_need, 16 << 20), 48 << 20)

    out = pl.pallas_call(
        kernel,
        out_shape=jax.ShapeDtypeStruct((m_pad, cout_pad), jnp.float32),
        grid_spec=pltpu.PrefetchScalarGridSpec(
            num_scalar_prefetch=0,
            grid=grid,
            in_specs=in_specs,
            out_specs=pl.BlockSpec((tm, cout_pad), lambda i, k: (i, 0)),
            scratch_shapes=[pltpu.VMEM((tm, cout_pad), jnp.float32)],
        ),
        compiler_params=pltpu.CompilerParams(
            dimension_semantics=("parallel", "arbitrary"),
            vmem_limit_bytes=vmem_limit,
        ),
    )(*operands)
    return out[:M]


# ----------------------------- Module wrapper ---------------------------------
class MetaConv2dLayerPallas:
    """JAX/Pallas equivalent of MetaConv2dLayer (groups=1)."""

    def __init__(self, in_channels, out_channels, kernel_size, stride, padding,
                 use_bias=True, groups=1, dilation_rate=1, key=None):
        assert groups == 1, "groups != 1 not implemented"
        self.in_channels = int(in_channels)
        self.out_channels = int(out_channels)
        self.kernel_size = int(kernel_size)
        self.stride = int(stride)
        self.padding = int(padding)
        self.dilation_rate = int(dilation_rate)
        self.use_bias = use_bias

        if key is None:
            key = jax.random.PRNGKey(0)
        # kaiming_normal_ (fan_in, leaky_relu a=0): std = sqrt(2 / fan_in)
        fan_in = self.in_channels * self.kernel_size * self.kernel_size
        std = (2.0 / fan_in) ** 0.5
        self.weight = std * jax.random.normal(
            key,
            (self.out_channels, self.in_channels, self.kernel_size, self.kernel_size),
            dtype=jnp.float32,
        )
        self.bias = jnp.zeros((self.out_channels,), jnp.float32) if use_bias else None

    def __call__(self, x, params=None):
        """x: [N, C_in, H, W] (NCHW, like PyTorch). Returns [N, C_out, OH, OW] f32."""
        if params is not None:
            weight = params["weight"]
            bias = params.get("bias", None) if self.use_bias else None
        else:
            weight, bias = self.weight, self.bias

        N, C_in, H, W = x.shape
        K = self.kernel_size
        S = self.stride
        P = self.padding
        D = self.dilation_rate
        C_out = self.out_channels

        eff_k = D * (K - 1) + 1
        OH = (H + 2 * P - eff_k) // S + 1
        OW = (W + 2 * P - eff_k) // S + 1

        # --- glue: NCHW -> NHWC (bf16), pad, im2col with lane padding ---
        x_nhwc = jnp.transpose(x, (0, 2, 3, 1)).astype(jnp.bfloat16)
        x_pad = jnp.pad(x_nhwc, ((0, 0), (P, P), (P, P), (0, 0)))

        patch_list = []
        for kh in range(K):
            for kw in range(K):
                h0 = kh * D
                w0 = kw * D
                sl = lax.slice(
                    x_pad,
                    (0, h0, w0, 0),
                    (N, h0 + (OH - 1) * S + 1, w0 + (OW - 1) * S + 1, C_in),
                    (1, S, S, 1),
                )  # [N, OH, OW, C_in]
                patch_list.append(sl)

        kdim = K * K * C_in
        kdim_pad = _round_up(kdim, LANE)
        if kdim_pad != kdim:
            # zero columns appended inside the concat (no extra full-array pad pass)
            patch_list.append(
                jnp.zeros((N, OH, OW, kdim_pad - kdim), jnp.bfloat16))
        # feature order: (kh, kw, c_in), zero-padded to kdim_pad
        patches = jnp.concatenate(patch_list, axis=-1).reshape(N * OH * OW, kdim_pad)

        # weight [C_out, C_in, KH, KW] -> [KH, KW, C_in, C_out] -> [Kdim, C_out]
        cout_pad = _round_up(C_out, LANE)
        w_mat = jnp.transpose(weight, (2, 3, 1, 0)).reshape(kdim, C_out)
        w_mat = w_mat.astype(jnp.bfloat16)
        w_mat = jnp.pad(w_mat, ((0, kdim_pad - kdim), (0, cout_pad - C_out)))

        if bias is not None:
            b_row = bias.reshape(1, C_out).astype(jnp.float32)
            b_row = jnp.pad(b_row, ((0, 0), (0, cout_pad - C_out)))
        else:
            b_row = None

        # --- hot path in Pallas ---
        out_mat = _pallas_im2col_matmul(patches, w_mat, b_row)  # [M, cout_pad] f32

        out = out_mat[:, :C_out].reshape(N, OH, OW, C_out)
        return jnp.transpose(out, (0, 3, 1, 2))  # back to NCHW


# ----------------------------- main ------------------------------------------
if __name__ == "__main__":
    key = jax.random.PRNGKey(0)
    k_x, k_w = jax.random.split(key)

    # small shapes consistent with a conv layer forward
    N, C_in, H, W = 2, 4, 16, 16
    C_out, ksize, stride, padding = 8, 3, 1, 1

    layer = MetaConv2dLayerPallas(C_in, C_out, ksize, stride, padding,
                                  use_bias=True, key=k_w)
    x = jax.random.normal(k_x, (N, C_in, H, W), dtype=jnp.float32)

    out = layer(x)
    out = jax.block_until_ready(out)

    # Reference: XLA conv on bf16-rounded inputs with f32 accumulation
    # (the kernel feeds the MXU bf16 and accumulates in f32).
    x_bf = x.astype(jnp.bfloat16).astype(jnp.float32)
    w_bf = layer.weight.astype(jnp.bfloat16).astype(jnp.float32)
    ref = lax.conv_general_dilated(
        x_bf, w_bf,
        window_strides=(stride, stride),
        padding=[(padding, padding), (padding, padding)],
        rhs_dilation=(1, 1),
        dimension_numbers=("NCHW", "OIHW", "NCHW"),
        precision=lax.Precision.HIGHEST,
    ) + layer.bias.reshape(1, C_out, 1, 1)

    assert out.shape == (N, C_out, H, W), out.shape
    max_err = float(jnp.max(jnp.abs(out - ref)))
    assert jnp.allclose(out, ref, atol=1e-2, rtol=1e-2), max_err

    print("KERNEL_OK")
</pallas_src>

<mosaic_0001>
module attributes {stable_mosaic.version = 11 : i64} {
  func.func @_conv_matmul_kernel(%arg0: i32, %arg1: i32, %arg2: memref<256x128xbf16, #tpu.memory_space<vmem>>, %arg3: memref<128x128xbf16, #tpu.memory_space<vmem>>, %arg4: memref<1x128xf32, #tpu.memory_space<vmem>>, %arg5: memref<256x128xf32, #tpu.memory_space<vmem>>, %arg6: memref<256x128xf32, #tpu.memory_space<vmem>>) attributes {dimension_semantics = [#tpu.dimension_semantics<parallel>, #tpu.dimension_semantics<arbitrary>], iteration_bounds = array<i64: 2, 1>, scalar_prefetch = 0 : i64, scratch_operands = 1 : i64, tpu.core_type = #tpu.core_type<tc>, window_params = [{transform_indices = @transform_0, window_bounds = array<i64: 256, 128>}, {transform_indices = @transform_1, window_bounds = array<i64: 128, 128>}, {pipeline_mode = #tpu.pipeline_mode<synchronous>, transform_indices = @transform_2, window_bounds = array<i64: 1, 128>}, {transform_indices = @transform_3, window_bounds = array<i64: 256, 128>}]} {
    %c0_i32 = arith.constant 0 : i32
    %0 = arith.cmpi eq, %arg1, %c0_i32 : i32
    %1 = arith.extui %0 : i1 to i32
    %c0_i32_0 = arith.constant 0 : i32
    %2 = arith.cmpi ne, %1, %c0_i32_0 : i32
    scf.if %2 {
      %cst_10 = arith.constant 0.000000e+00 : f32
      %12 = vector.broadcast %cst_10 : f32 to vector<256x128xf32>
      %c0_11 = arith.constant 0 : index
      %c0_12 = arith.constant 0 : index
      %13 = vector.load %arg6[%c0_11, %c0_12] : memref<256x128xf32, #tpu.memory_space<vmem>>, vector<256x128xf32>
      tpu.vector_store %arg6[%c0_11, %c0_12], %12 {strides = array<i32>} : memref<256x128xf32, #tpu.memory_space<vmem>>, vector<256x128xf32>,
    } else {
    }
    %c0 = arith.constant 0 : index
    %c0_1 = arith.constant 0 : index
    %3 = vector.load %arg6[%c0, %c0_1] : memref<256x128xf32, #tpu.memory_space<vmem>>, vector<256x128xf32>
    %c0_2 = arith.constant 0 : index
    %c0_3 = arith.constant 0 : index
    %4 = vector.load %arg2[%c0_2, %c0_3] : memref<256x128xbf16, #tpu.memory_space<vmem>>, vector<256x128xbf16>
    %c0_4 = arith.constant 0 : index
    %c0_5 = arith.constant 0 : index
    %5 = vector.load %arg3[%c0_4, %c0_5] : memref<128x128xbf16, #tpu.memory_space<vmem>>, vector<128x128xbf16>
    %cst = arith.constant dense<0.000000e+00> : vector<256x128xf32>
    %6 = tpu.matmul %4, %5, %cst {dimension_numbers = #tpu.dot_dimension_numbers<[1], [0], [0], [1], [0, 0, 1, 1], [], []>} : vector<256x128xbf16>, vector<128x128xbf16>, vector<256x128xf32> -> vector<256x128xf32>
    %7 = arith.addf %3, %6 : vector<256x128xf32>
    %c0_6 = arith.constant 0 : index
    %c0_7 = arith.constant 0 : index
    %8 = vector.load %arg6[%c0_6, %c0_7] : memref<256x128xf32, #tpu.memory_space<vmem>>, vector<256x128xf32>
    tpu.vector_store %arg6[%c0_6, %c0_7], %7 {strides = array<i32>} : memref<256x128xf32, #tpu.memory_space<vmem>>, vector<256x128xf32>,
    %c0_i32_8 = arith.constant 0 : i32
    %9 = arith.cmpi eq, %arg1, %c0_i32_8 : i32
    %10 = arith.extui %9 : i1 to i32
    %c0_i32_9 = arith.constant 0 : i32
    %11 = arith.cmpi ne, %10, %c0_i32_9 : i32
    scf.if %11 {
      %c0_10 = arith.constant 0 : index
      %c0_11 = arith.constant 0 : index
      %12 = vector.load %arg6[%c0_10, %c0_11] : memref<256x128xf32, #tpu.memory_space<vmem>>, vector<256x128xf32>
      %c0_12 = arith.constant 0 : index
      %c0_13 = arith.constant 0 : index
      %13 = vector.load %arg4[%c0_12, %c0_13] : memref<1x128xf32, #tpu.memory_space<vmem>>, vector<1x128xf32>
      %14 = vector.broadcast %13 : vector<1x128xf32> to vector<256x128xf32>
      %15 = arith.addf %12, %14 : vector<256x128xf32>
      %c0_14 = arith.constant 0 : index
      %c0_15 = arith.constant 0 : index
      %16 = vector.load %arg5[%c0_14, %c0_15] : memref<256x128xf32, #tpu.memory_space<vmem>>, vector<256x128xf32>
      tpu.vector_store %arg5[%c0_14, %c0_15], %15 {strides = array<i32>} : memref<256x128xf32, #tpu.memory_space<vmem>>, vector<256x128xf32>,
    } else {
    }
    return
  }
  func.func @transform_0(%arg0: i32, %arg1: i32) -> (i32, i32) {
    %c0_i32 = arith.constant 0 : i32
    return %arg0, %arg1 : i32, i32
  }
  func.func @transform_1(%arg0: i32, %arg1: i32) -> (i32, i32) {
    %c0_i32 = arith.constant 0 : i32
    %c0_i32_0 = arith.constant 0 : i32
    return %arg1, %c0_i32 : i32, i32
  }
  func.func @transform_2(%arg0: i32, %arg1: i32) -> (i32, i32) {
    %c0_i32 = arith.constant 0 : i32
    %c0_i32_0 = arith.constant 0 : i32
    %c0_i32_1 = arith.constant 0 : i32
    return %c0_i32, %c0_i32_0 : i32, i32
  }
  func.func @transform_3(%arg0: i32, %arg1: i32) -> (i32, i32) {
    %c0_i32 = arith.constant 0 : i32
    %c0_i32_0 = arith.constant 0 : i32
    return %arg0, %c0_i32 : i32, i32
  }
}

</mosaic_0001>

<bundles_post_ra>
// kernel: tpu_custom_call.1
= control target key start
LH: loop header
LB: loop body
LE: loop exit
PB: predicated region body
PF: predicated region fallthrough
CT: control target
= control target key end

     0   :  { %8 = vsyncpa [#allocation4], 0  ;;  %s1653_s0 = inlined_call_operand.hbm [shape: bf16[512,128], index: 0, kind: input, shape index: {}]   ;;  %s1654_s1 = inlined_call_operand.hbm [shape: bf16[128,128], index: 1, kind: input, shape index: {}]   ;;  %s1655_s2 = inlined_call_operand.vmem [shape: f32[1,128], index: 2, kind: input, shape index: {}]   ;;  %s1656_s3 = inlined_call_operand.hbm [shape: f32[512,128], index: 3, kind: output, shape index: {}]  }
   0x1   :  { %10 = vsyncpa [#allocation4 + $0x1], 0 }
   0x2   :  { %11 = vsyncpa [#allocation7], 0 }
   0x3   :  { %12 = vsyncpa [#allocation5], 0 }
   0x4   :  { %14 = vsyncpa [#allocation5 + $0x1], 0  ;;  %s1337_s12 = smov 0   ;;  %s1339_s13 = smov 0  }
   0x5   :  { %s1341_s14 = smov 0   ;;  %s1343_s15 = smov 0  }
   0x6   :  { %s1345_s16 = smov 0   ;;  %s1347_s17 = smov 0  }
   0x7 LB: > { %s931_s18 = sadd.s32 4294967295, %s1308_s17   ;;  %s932_s19 = sadd.s32 4294967294, %s1308_s17   ;;  %s1308_s17 = sphi %s1347_s17, %s20_s17   ;;  %s1304_s16 = sphi %s1345_s16, %s1680_s16   ;;  %s1300_s15 = sphi %s1343_s15, %s1679_s15   ;;  %s1296_s14 = sphi %s1341_s14, %s1678_s14   ;;  %s1292_s13 = sphi %s1339_s13, %s1677_s13   ;;  %s1288_s12 = sphi %s1337_s12, %s1676_s12  }
   0x8   : > { %p54_p0 = scmp.ne.s32.totalorder %s1292_s13, %s1288_s12  ;;  %p1371_p1 = scmp.eq.s32.totalorder %s931_s18, 0 }
   0x9   : > { %p1375_p2 = scmp.eq.s32.totalorder %s931_s18, 1  ;;  %p131_p3 = scmp.eq.s32.totalorder %s932_s19, 1 }
   0xa   : > { %s1661_s20 = scalar_select %p1371_p1, 1, 0 }
   0xb   : > { %s1662_s21 = scalar_select %p1375_p2, 1, 0 }
   0xc   : > { %p1381_p4 = por %p1371_p1, %p54_p0  ;;  %p933_p5 = scmp.ge.s32.totalorder %s1308_s17, 1 }
   0xd   : > { %p1386_p6 = por %p131_p3, %p54_p0  ;;  %p138_p7 = scmp.lt.s32.totalorder %s1308_s17, 3 }
   0xe   : > { %s1663_s22 = scalar_select %p1381_p4, 1, 0 }
   0xf   : > { %s1664_s23 = scalar_select %p1386_p6, 1, 0 }
  0x10   : > { %p1391_p8 = pnand %p933_p5, %p138_p7  ;;  %s1310_s25 = smov [#allocation6]  }
  0x11   : > { %s153_s26 = sshll.u32 %s1310_s25, 4  ;;  %s32_s28 = sadd.s32 1, %s1304_s16  ;;  %s154_s26 = int_to_ptr.vmem [resolvable:$true] %s153_s26 }
  0x12   : > { %s1665_s24 = scalar_select %p1391_p8, 1, 0 }
  0x13   : > { %p1071_p9 = pneg %p1391_p8  ;;  %s1164_s4 = scalar_lea.hbm %s1654_s1, 1024 }
  0x14   : > { %p1165_p12 = scmp.ne.s32.totalorder %s1654_s1, %s1164_s4  ;;  %p1171_p5 = scmp.lt.u32.totalorder %s1164_s4, %s1654_s1 }
  0x15   : > { %p1400_p11 = pnand %p1071_p9, %p1371_p1 }
  0x17   : > { %p1166_p13 = pneg %p1400_p11 }
  0x19   : > { %p1167_p0 = pnand %p1166_p13, %p1165_p12 }
  0x1b   : > { %p1168_p3 = pneg %p1167_p0 }
  0x1d   : > { %p1173_p7 = pnand %p1171_p5, %p1168_p3 }
  0x1f   : > { %1176 = shalt.err (!%p1173_p7)
}
  0x20   : > { %s1177_s9 = scalar_lea.vmem %s154_s26, 1024  ;;  %p1185_p1 = scmp.lt.s32.totalorder %s154_s26, %s154_s26 }
  0x21   : > { %p1178_p9 = scmp.ne.s32.totalorder %s154_s26, %s1177_s9  ;;  %p1186_p4 = scmp.lt.s32.totalorder %s1177_s9, %s1177_s9 }
  0x23   : > { %p1180_p10 = pnand %p1178_p9, %p1166_p13  ;;  %p1187_p8 = por %p1186_p4, %p1185_p1 }
  0x25   : > { %p1181_p6 = pneg %p1180_p10 }
  0x27   : > { %p1188_p2 = pnand %p1187_p8, %p1181_p6 }
  0x29   : > { %1191 = shalt.err (!%p1188_p2)
}
  0x2a   : > { %s1311_s10 = smov 64   ;;  %s1312_s11 = smov 4  }
  0x2b   : > { %1074 = dma.hbm_to_vmem [thread:$0]  (!%p1400_p11), %s1654_s1, 1024, %s154_s26, [#allocation7], %s1311_s10, %s1311_s10, %s1312_s11  }
  0x2c   : > { %p34_p1 = scmp.ge.s32.totalorder %s32_s28, 2  ;;  %s41_s25 = sadd.s32 1, %s1296_s14 }
  0x2d   : > { %p48_p2 = scmp.ne.s32.totalorder %s1296_s14, %s1292_s13  ;;  %p49_p4 = scmp.eq.s32.totalorder %s1308_s17, 0 }
  0x2e   : > { %s1682_s28 = smov (%p34_p1, %s32_s28), 0  ;;  %p1668_p8 = scmp.ne.s32.totalorder %s1662_s21, 0 }
  0x2f   : > { %p1430_p6 = por %p49_p4, %p48_p2  ;;  %s36_s30 = ssub.s32 %s1304_s16, %s1682_s28 }
  0x30   : > { %p1436_p10 = por %p1668_p8, %p48_p2  ;;  %p1084_p12 = scmp.lt.s32.totalorder %s1308_s17, 2 }
  0x31   : > { %p39_p11 = scmp.eq.s32.totalorder %s36_s30, 0  ;;  %s170_s26 = sand.u32 1, %s1296_s14  }
  0x32   : > { %s936_s4 = sshll.u32 %s170_s26, 7  ;;  %s973_s6 = sshll.u32 %s1304_s16, 11 }
  0x33   : > { %s1445_s5 = scalar_select %p39_p11, %s1296_s14, %s41_s25  }
  0x34   : > { %s1451_s9 = scalar_lea.hbm %s1653_s0, %s973_s6  ;;  %s174_s21 = scalar_lea.vmem [#allocation3], %s936_s4 }
  0x35   : > { %s182_s18 = sshll.u32 %s174_s21, 4  ;;  %p1457_p13 = pnand %p1084_p12, %p1430_p6  ;;  %s1453_s18 = int_to_ptr.vmem [resolvable:$true] %s182_s18 }
  0x36   : > { %s1461_s25 = scalar_lea.sflag [#allocation4], %s170_s26  ;;  %s1192_s30 = scalar_lea.hbm %s1451_s9, 2048 }
  0x37   : > { %p1193_p0 = scmp.ne.s32.totalorder %s1451_s9, %s1192_s30  ;;  %p1194_p3 = pneg %p1457_p13 }
  0x38   : > { %s1197_s29 = scalar_lea.hbm %s1653_s0, 4096  ;;  %p1198_p9 = scmp.lt.u32.totalorder %s1451_s9, %s1653_s0 }
  0x39   : > { %p1195_p5 = pnand %p1194_p3, %p1193_p0  ;;  %p1199_p1 = scmp.lt.u32.totalorder %s1197_s29, %s1192_s30 }
  0x3a   : > { %p1201_p4 = scmp.lt.u32.totalorder %s1192_s30, %s1451_s9 }
  0x3b   : > { %p1196_p7 = pneg %p1195_p5  ;;  %p1200_p2 = por %p1199_p1, %p1198_p9 }
  0x3d   : > { %p1202_p6 = por %p1201_p4, %p1200_p2 }
  0x3f   : > { %p1203_p8 = pnand %p1202_p6, %p1196_p7 }
  0x41   : > { %1206 = shalt.err (!%p1203_p8)
}
  0x42   : > { %s1207_s26 = scalar_lea.vmem %s1453_s18, 2048  ;;  %s1313_s21 = smov [#allocation3]  }
  0x43   : > { %p1208_p12 = scmp.ne.s32.totalorder %s1453_s18, %s1207_s26  ;;  %s1212_s4 = sshll.u32 %s1313_s21, 4  ;;  %s1213_s4 = int_to_ptr.vmem [resolvable:$false] %s1212_s4 }
  0x44   : > { %s1214_s6 = scalar_lea.vmem %s1213_s4, 4096  ;;  %p1215_p5 = scmp.lt.s32.totalorder %s1453_s18, %s1213_s4 }
  0x45   : > { %p1210_p11 = pnand %p1208_p12, %p1194_p3  ;;  %p1216_p9 = scmp.lt.s32.totalorder %s1214_s6, %s1207_s26 }
  0x47   : > { %p1211_p0 = pneg %p1210_p11  ;;  %p1217_p1 = por %p1216_p9, %p1215_p5 }
  0x49   : > { %p1218_p2 = pnand %p1217_p1, %p1211_p0 }
  0x4b   : > { %1221 = shalt.err (!%p1218_p2)
}
  0x4c   : > { %1078 = dma.hbm_to_vmem [thread:$0]  (!%p1457_p13), %s1451_s9, 2048, %s1453_s18, %s1461_s25, %s1311_s10, %s1311_s10, %s1312_s11  }
  0x4d   : > { %p1671_p3 = scmp.ne.s32.totalorder %s1665_s24, 0 }
  0x4e   : > { %s1495_s30 = sand.u32 (!%p1671_p3), 1, %s1292_s13   ;;  %p1672_p7 = scmp.ne.s32.totalorder (!%p1671_p3), %s1663_s22, 0 }
  0x4f   : > { %194 = sbr.rel (%p1671_p3) target bundleno = 379 (0x17b), region = 32  ;;  %s940_s29 = sshll.u32 (!%p1671_p3), %s1495_s30, 7 }
  0x50   : > { %s197_s7 = scalar_lea.sflag (!%p1671_p3), [#allocation4], %s1495_s30  ;;  %s1499_s8 = scalar_lea.vmem (!%p1671_p3), [#allocation3], %s940_s29 }
  0x56   : > { %1275 = dma.done.wait (%p1672_p7), %s197_s7, 2048  }
  0x57   : > { %1277 = vsyncadd (%p1672_p7), %s197_s7, 4294965248  ;;  %p1673_p13 = scmp.ne.s32.totalorder %s1661_s20, 0 }
  0x59   : > { %1279 = dma.done.wait (%p1673_p13), [#allocation7], 1024  }
  0x5a   : > { %1281 = vsyncadd (%p1673_p13), [#allocation7], 4294966272  ;;  %v1140_v0 = vld [vmem:[#allocation6] sm:$0xff]   ;;  %v1141_v1 = vld [vmem:[#allocation6 + $0x8] sm:$0xff]   ;;  %s942_s20 = sshll.u32 %s1495_s30, 8  ;;  %s974_s11 = sshll.u32 %s1300_s15, 12 }
  0x5b   : > { %999 = vmatprep.subr.bf16.mxu0 %v1140_v0  ;;  %1047 = vmatprep.subr.bf16.mxu1 %v1140_v0  ;;  %v1142_v2 = vld [vmem:[#allocation6 + $0x10] sm:$0xff]   ;;  %v1143_v3 = vld [vmem:[#allocation6 + $0x18] sm:$0xff]   ;;  %v1148_v4 = vld [vmem:[%s1499_s8] sm:$0xff]   ;;  %s1535_s10 = scalar_lea.vmem [#allocation8], %s942_s20  ;;  %s1594_s19 = scalar_lea.hbm %s1656_s3, %s974_s11 }
  0x5c   : > { %1000 = vmatpush3.bf16.msra.mxu0 %v1140_v0  ;;  %1055 = vmatpush3.bf16.msra.mxu1 %v1140_v0  ;;  %v1149_v5 = vld [vmem:[%s1499_s8 + $0x40] sm:$0xff]   ;;  %v1145_v7 = vld [vmem:[#allocation6 + $0x28] sm:$0xff]   ;;  %v1146_v8 = vld [vmem:[#allocation6 + $0x30] sm:$0xff]   ;;  %s836_s9 = sshll.u32 %s1535_s10, 4  ;;  %s823_s25 = scalar_lea.sflag [#allocation5], %s1495_s30  ;;  %s1596_s9 = int_to_ptr.vmem [resolvable:$true] %s836_s9 }
  0x5d   : > { %1001 = vmatprep.subr.bf16.mxu0 %v1141_v1  ;;  %1048 = vmatprep.subr.bf16.mxu1 %v1141_v1  ;;  %v1144_v6 = vld [vmem:[#allocation6 + $0x20] sm:$0xff]   ;;  %v1147_v9 = vld [vmem:[#allocation6 + $0x38] sm:$0xff]   ;;  %v1150_v10 = vld [vmem:[%s1499_s8 + $0x8] sm:$0xff]   ;;  %s1222_s26 = scalar_lea.vmem %s1596_s9, 4096  ;;  %s1314_s21 = smov [#allocation8]  }
  0x5e   : > { %1015 = vmatprep.mubr.bf16.mxu0 %v1148_v4  ;;  %1031 = vmatprep.mubr.bf16.mxu1 %v1149_v5  ;;  %v1151_v11 = vld [vmem:[%s1499_s8 + $0x48] sm:$0xff]   ;;  %v1152_v12 = vld [vmem:[%s1499_s8 + $0x10] sm:$0xff]   ;;  %v1154_v14 = vld [vmem:[%s1499_s8 + $0x18] sm:$0xff]   ;;  %p1223_p4 = scmp.ne.s32.totalorder %s1596_s9, %s1222_s26  ;;  %s1226_s4 = sshll.u32 %s1314_s21, 4  ;;  %s1227_s4 = int_to_ptr.vmem [resolvable:$false] %s1226_s4 }
  0x5f   : > { %v1153_v13 = vld [vmem:[%s1499_s8 + $0x50] sm:$0xff]   ;;  %v1155_v15 = vld [vmem:[%s1499_s8 + $0x58] sm:$0xff]   ;;  %v1156_v16 = vld [vmem:[%s1499_s8 + $0x20] sm:$0xff]   ;;  %s1228_s6 = scalar_lea.vmem %s1227_s4, 8192  ;;  %p1229_p12 = scmp.lt.s32.totalorder %s1596_s9, %s1227_s4 }
  0x60   : > { %1002 = vmatpush3.bf16.msra.mxu0 %v1141_v1  ;;  %1056 = vmatpush3.bf16.msra.mxu1 %v1141_v1  ;;  %v1157_v17 = vld [vmem:[%s1499_s8 + $0x60] sm:$0xff]   ;;  %v1158_v18 = vld [vmem:[%s1499_s8 + $0x28] sm:$0xff]   ;;  %v1160_v20 = vld [vmem:[%s1499_s8 + $0x30] sm:$0xff]   ;;  %p1224_p6 = pnand %p1223_p4, %p1436_p10  ;;  %p1230_p11 = scmp.lt.s32.totalorder %s1228_s6, %s1222_s26 }
  0x61   : > { %1003 = vmatprep.subr.bf16.mxu0 %v1142_v2  ;;  %1049 = vmatprep.subr.bf16.mxu1 %v1142_v2  ;;  %v1159_v19 = vld [vmem:[%s1499_s8 + $0x68] sm:$0xff]   ;;  %v1161_v21 = vld [vmem:[%s1499_s8 + $0x70] sm:$0xff]   ;;  %v1162_v22 = vld [vmem:[%s1499_s8 + $0x38] sm:$0xff]  }
  0x62   : > { %v1163_v23 = vld [vmem:[%s1499_s8 + $0x78] sm:$0xff]   ;;  %v1529_v24 = vld [vmem:[%s1655_s2] ss:$0 sm:$0xff]  ;;  %p1225_p8 = pneg %p1224_p6  ;;  %p1231_p0 = por %p1230_p11, %p1229_p12 }
  0x64   : > { %1004 = vmatpush3.bf16.msra.mxu0 %v1142_v2  ;;  %1057 = vmatpush3.bf16.msra.mxu1 %v1142_v2  ;;  %p1232_p5 = pnand %p1231_p0, %p1225_p8 }
  0x65   : > { %1005 = vmatprep.subr.bf16.mxu0 %v1143_v3  ;;  %1050 = vmatprep.subr.bf16.mxu1 %v1143_v3 }
  0x68   : > { %1006 = vmatpush3.bf16.msra.mxu0 %v1143_v3  ;;  %1058 = vmatpush3.bf16.msra.mxu1 %v1143_v3 }
  0x69   : > { %1007 = vmatprep.subr.bf16.mxu0 %v1144_v6  ;;  %1051 = vmatprep.subr.bf16.mxu1 %v1144_v6 }
  0x6c   : > { %1008 = vmatpush3.bf16.msra.mxu0 %v1144_v6  ;;  %1059 = vmatpush3.bf16.msra.mxu1 %v1144_v6 }
  0x6d   : > { %1009 = vmatprep.subr.bf16.mxu0 %v1145_v7  ;;  %1052 = vmatprep.subr.bf16.mxu1 %v1145_v7 }
  0x70   : > { %1010 = vmatpush3.bf16.msra.mxu0 %v1145_v7  ;;  %1060 = vmatpush3.bf16.msra.mxu1 %v1145_v7 }
  0x71   : > { %1011 = vmatprep.subr.bf16.mxu0 %v1146_v8  ;;  %1053 = vmatprep.subr.bf16.mxu1 %v1146_v8 }
  0x74   : > { %1012 = vmatpush3.bf16.msra.mxu0 %v1146_v8  ;;  %1061 = vmatpush3.bf16.msra.mxu1 %v1146_v8 }
  0x75   : > { %1013 = vmatprep.subr.bf16.mxu0 %v1147_v9  ;;  %1054 = vmatprep.subr.bf16.mxu1 %v1147_v9 }
  0x78   : > { %1014 = vmatpush3.bf16.msra.mxu0 %v1147_v9  ;;  %1062 = vmatpush3.bf16.msra.mxu1 %v1147_v9 }
  0x7b   : > { %1016 = vmatmul.mubr.bf16.vlgmr.msra.gmra.mrb[0].mxu0 %v1150_v10  ;;  %1032 = vmatmul.mubr.bf16.vlgmr.msra.gmra.mrb[0].mxu1 %v1151_v11 }
  0x7c   : > { %1019 = vmatprep.mubr.bf16.mxu0 %v1152_v12  ;;  %1035 = vmatprep.mubr.bf16.mxu1 %v1153_v13 }
  0x83   : > { %1020 = vmatmul.mubr.bf16.gmra.mrb[4].mxu0 %v1154_v14  ;;  %1036 = vmatmul.mubr.bf16.gmra.mrb[4].mxu1 %v1155_v15 }
  0x84   : > { %1023 = vmatprep.mubr.bf16.mxu0 %v1156_v16  ;;  %1039 = vmatprep.mubr.bf16.mxu1 %v1157_v17 }
  0x8b   : > { %1024 = vmatmul.mubr.bf16.gmra.mrb[8].mxu0 %v1158_v18  ;;  %1040 = vmatmul.mubr.bf16.gmra.mrb[8].mxu1 %v1159_v19 }
  0x8c   : > { %1027 = vmatprep.mubr.bf16.mxu0 %v1160_v20  ;;  %1043 = vmatprep.mubr.bf16.mxu1 %v1161_v21 }
  0x93   : > { %1028 = vmatmul.mubr.bf16.gmra.mrb[12].mxu0 %v1162_v22  ;;  %1044 = vmatmul.mubr.bf16.gmra.mrb[12].mxu1 %v1163_v23 }
 0x14e   : > { %v1017_v25 = vpop.f32.mrb[0].mxu0  ;;  %v1033_v26 = vpop.f32.mrb[0].mxu1 }
 0x14f   : > { %v760_v27 = vadd.f32 %v1017_v25, %v1529_v24  ;;  %v776_v28 = vadd.f32 %v1033_v26, %v1529_v24  ;;  %v525_v29 = vpop.f32.mrb[1].mxu0  ;;  %v589_v30 = vpop.f32.mrb[1].mxu1 }
 0x150   : > { %v758_v31 = vadd.f32 %v1529_v24, %v525_v29  ;;  %v774_v32 = vadd.f32 %v1529_v24, %v589_v30  ;;  %v1018_v33 = vpop.f32.mrb[2].mxu0  ;;  %v1034_v34 = vpop.f32.mrb[2].mxu1 }
 0x151   : > { %792 = vst [vmem:[%s1535_s10 + $0x10] sm:$0xff] %v760_v27  ;;  %808 = vst [vmem:[%s1535_s10 + $0x90] sm:$0xff] %v776_v28  ;;  %v761_v35 = vadd.f32 %v1018_v33, %v1529_v24  ;;  %v777_v36 = vadd.f32 %v1034_v34, %v1529_v24  ;;  %v528_v37 = vpop.f32.mrb[3].mxu0  ;;  %v592_v38 = vpop.f32.mrb[3].mxu1 }
 0x152   : > { %790 = vst [vmem:[%s1535_s10] sm:$0xff] %v758_v31  ;;  %806 = vst [vmem:[%s1535_s10 + $0x80] sm:$0xff] %v774_v32  ;;  %v759_v39 = vadd.f32 %v1529_v24, %v528_v37  ;;  %v775_v40 = vadd.f32 %v1529_v24, %v592_v38 }
 0x153   : > { %793 = vst [vmem:[%s1535_s10 + $0x18] sm:$0xff] %v761_v35  ;;  %809 = vst [vmem:[%s1535_s10 + $0x98] sm:$0xff] %v777_v36 }
 0x154   : > { %791 = vst [vmem:[%s1535_s10 + $0x8] sm:$0xff] %v759_v39  ;;  %807 = vst [vmem:[%s1535_s10 + $0x88] sm:$0xff] %v775_v40 }
 0x156   : > { %v1021_v41 = vpop.f32.mrb[4].mxu0  ;;  %v1037_v42 = vpop.f32.mrb[4].mxu1 }
 0x157   : > { %v764_v43 = vadd.f32 %v1021_v41, %v1529_v24  ;;  %v780_v44 = vadd.f32 %v1037_v42, %v1529_v24  ;;  %v541_v45 = vpop.f32.mrb[5].mxu0  ;;  %v605_v46 = vpop.f32.mrb[5].mxu1 }
 0x158   : > { %v762_v47 = vadd.f32 %v1529_v24, %v541_v45  ;;  %v778_v48 = vadd.f32 %v1529_v24, %v605_v46  ;;  %v1022_v49 = vpop.f32.mrb[6].mxu0  ;;  %v1038_v50 = vpop.f32.mrb[6].mxu1 }
 0x159   : > { %796 = vst [vmem:[%s1535_s10 + $0x30] sm:$0xff] %v764_v43  ;;  %812 = vst [vmem:[%s1535_s10 + $0xb0] sm:$0xff] %v780_v44  ;;  %v765_v51 = vadd.f32 %v1022_v49, %v1529_v24  ;;  %v781_v52 = vadd.f32 %v1038_v50, %v1529_v24  ;;  %v544_v53 = vpop.f32.mrb[7].mxu0  ;;  %v608_v54 = vpop.f32.mrb[7].mxu1 }
 0x15a   : > { %794 = vst [vmem:[%s1535_s10 + $0x20] sm:$0xff] %v762_v47  ;;  %810 = vst [vmem:[%s1535_s10 + $0xa0] sm:$0xff] %v778_v48  ;;  %v763_v55 = vadd.f32 %v1529_v24, %v544_v53  ;;  %v779_v56 = vadd.f32 %v1529_v24, %v608_v54 }
 0x15b   : > { %797 = vst [vmem:[%s1535_s10 + $0x38] sm:$0xff] %v765_v51  ;;  %813 = vst [vmem:[%s1535_s10 + $0xb8] sm:$0xff] %v781_v52 }
 0x15c   : > { %795 = vst [vmem:[%s1535_s10 + $0x28] sm:$0xff] %v763_v55  ;;  %811 = vst [vmem:[%s1535_s10 + $0xa8] sm:$0xff] %v779_v56 }
 0x15e   : > { %v1025_v57 = vpop.f32.mrb[8].mxu0  ;;  %v1041_v58 = vpop.f32.mrb[8].mxu1 }
 0x15f   : > { %v768_v59 = vadd.f32 %v1025_v57, %v1529_v24  ;;  %v784_v60 = vadd.f32 %v1041_v58, %v1529_v24  ;;  %v557_v61 = vpop.f32.mrb[9].mxu0  ;;  %v621_v62 = vpop.f32.mrb[9].mxu1 }
 0x160   : > { %v766_v63 = vadd.f32 %v1529_v24, %v557_v61  ;;  %v782_v0 = vadd.f32 %v1529_v24, %v621_v62  ;;  %v1026_v1 = vpop.f32.mrb[10].mxu0  ;;  %v1042_v2 = vpop.f32.mrb[10].mxu1 }
 0x161   : > { %800 = vst [vmem:[%s1535_s10 + $0x50] sm:$0xff] %v768_v59  ;;  %816 = vst [vmem:[%s1535_s10 + $0xd0] sm:$0xff] %v784_v60  ;;  %v769_v3 = vadd.f32 %v1026_v1, %v1529_v24  ;;  %v785_v4 = vadd.f32 %v1042_v2, %v1529_v24  ;;  %v560_v5 = vpop.f32.mrb[11].mxu0  ;;  %v624_v6 = vpop.f32.mrb[11].mxu1 }
 0x162   : > { %798 = vst [vmem:[%s1535_s10 + $0x40] sm:$0xff] %v766_v63  ;;  %814 = vst [vmem:[%s1535_s10 + $0xc0] sm:$0xff] %v782_v0  ;;  %v767_v7 = vadd.f32 %v1529_v24, %v560_v5  ;;  %v783_v8 = vadd.f32 %v1529_v24, %v624_v6 }
 0x163   : > { %801 = vst [vmem:[%s1535_s10 + $0x58] sm:$0xff] %v769_v3  ;;  %817 = vst [vmem:[%s1535_s10 + $0xd8] sm:$0xff] %v785_v4 }
 0x164   : > { %799 = vst [vmem:[%s1535_s10 + $0x48] sm:$0xff] %v767_v7  ;;  %815 = vst [vmem:[%s1535_s10 + $0xc8] sm:$0xff] %v783_v8 }
 0x166   : > { %v1029_v9 = vpop.f32.mrb[12].mxu0  ;;  %v1045_v10 = vpop.f32.mrb[12].mxu1 }
 0x167   : > { %v772_v11 = vadd.f32 %v1029_v9, %v1529_v24  ;;  %v788_v12 = vadd.f32 %v1045_v10, %v1529_v24  ;;  %v573_v13 = vpop.f32.mrb[13].mxu0  ;;  %v637_v14 = vpop.f32.mrb[13].mxu1 }
 0x168   : > { %v770_v15 = vadd.f32 %v1529_v24, %v573_v13  ;;  %v786_v16 = vadd.f32 %v1529_v24, %v637_v14  ;;  %v1030_v17 = vpop.f32.mrb[14].mxu0  ;;  %v1046_v18 = vpop.f32.mrb[14].mxu1 }
 0x169   : > { %804 = vst [vmem:[%s1535_s10 + $0x70] sm:$0xff] %v772_v11  ;;  %820 = vst [vmem:[%s1535_s10 + $0xf0] sm:$0xff] %v788_v12  ;;  %v773_v19 = vadd.f32 %v1030_v17, %v1529_v24  ;;  %v789_v20 = vadd.f32 %v1046_v18, %v1529_v24  ;;  %v576_v21 = vpop.f32.mrb[15].mxu0  ;;  %v640_v22 = vpop.f32.mrb[15].mxu1 }
 0x16a   : > { %802 = vst [vmem:[%s1535_s10 + $0x60] sm:$0xff] %v770_v15  ;;  %818 = vst [vmem:[%s1535_s10 + $0xe0] sm:$0xff] %v786_v16  ;;  %v771_v23 = vadd.f32 %v1529_v24, %v576_v21  ;;  %v787_v25 = vadd.f32 %v1529_v24, %v640_v22 }
 0x16b   : > { %805 = vst [vmem:[%s1535_s10 + $0x78] sm:$0xff] %v773_v19  ;;  %821 = vst [vmem:[%s1535_s10 + $0xf8] sm:$0xff] %v789_v20 }
 0x16c   : > { %803 = vst [vmem:[%s1535_s10 + $0x68] sm:$0xff] %v771_v23  ;;  %819 = vst [vmem:[%s1535_s10 + $0xe8] sm:$0xff] %v787_v25 }
 0x16d   : > { %1235 = shalt.err (!%p1232_p5)
}
 0x16e   : > { %s1236_s29 = scalar_lea.hbm %s1594_s19, 4096  ;;  %s1240_s20 = scalar_lea.hbm %s1656_s3, 8192 }
 0x16f   : > { %p1237_p9 = scmp.ne.s32.totalorder %s1594_s19, %s1236_s29  ;;  %p1241_p3 = scmp.lt.u32.totalorder %s1594_s19, %s1656_s3 }
 0x170   : > { %p1242_p7 = scmp.lt.u32.totalorder %s1240_s20, %s1236_s29  ;;  %p1244_p4 = scmp.lt.u32.totalorder %s1236_s29, %s1594_s19 }
 0x171   : > { %p1238_p1 = pnand %p1237_p9, %p1436_p10 }
 0x172   : > { %p1243_p13 = por %p1242_p7, %p1241_p3 }
 0x173   : > { %p1239_p2 = pneg %p1238_p1 }
 0x174   : > { %p1245_p6 = por %p1244_p4, %p1243_p13 }
 0x176   : > { %p1246_p8 = pnand %p1245_p6, %p1239_p2 }
 0x178   : > { %1249 = shalt.err (!%p1246_p8)
}
 0x179   : > { %s1315_s10 = smov 128   ;;  %s1316_s11 = smov 8  }
 0x17a   : > { %1069 = dma.vmem_to_hbm [thread:$0]  (%p1436_p10), %s1596_s9, 4096, %s1594_s19, %s823_s25, %s1315_s10, %s1315_s10, %s1316_s11  }
 0x17b PF: > { %s851_s15 = sand.u32 1, %s1288_s12   ;;  %p1674_p12 = scmp.ne.s32.totalorder %s1664_s23, 0 }
 0x17c   : > { %p1675_p11 = scmp.ge.s32.totalorder %s1308_s17, 2  ;;  %s852_s18 = scalar_lea.sflag [#allocation5], %s851_s15 }
 0x17e   : > { %p1080_p0 = pnand %p1675_p11, %p1674_p12 }
 0x180   : > { %1283 = dma.done.wait (!%p1080_p0), %s852_s18, 4096  }
 0x181   : > { %1285 = vsyncadd (!%p1080_p0), %s852_s18, 4294963200  ;;  %s20_s17 = sadd.s32 1, %s1308_s17   ;;  %s1676_s12 = smov %s1292_s13 }
 0x182   : > { %p17_p5 = scmp.ge.s32.totalorder %s20_s17, 4   ;;  %s1677_s13 = smov %s1296_s14 }
 0x183   : > { %s1678_s14 = smov %s1445_s5  ;;  %s1679_s15 = smov %s1304_s16 }
 0x184   : > { %s1680_s16 = smov %s1682_s28  ;;  %19 = sbr.rel (!%p17_p5) target bundleno = 7 (0x7), region = 90 }
 0x18b   :  { %857 = vsyncpa [#allocation4], 1 }
 0x18c   :  { %859 = vsyncpa [#allocation4 + $0x1], 1 }
 0x18d   :  { %860 = vsyncpa [#allocation7], 1 }
 0x18e   :  { %861 = vsyncpa [#allocation5], 1 }
 0x18f   :  { %863 = vsyncpa [#allocation5 + $0x1], 1 }

</bundles_post_ra>
